<compile_context>
chip_gen: v7x
topology: tpu7x:2x2x1
jax: 0.10.0
libtpu: 0.0.40
codegen_flags: <defaults>
</compile_context>

<pallas_src>
import jax
import jax.numpy as jnp
from jax.experimental import pallas as pl
from jax.experimental.pallas import tpu as pltpu

HIDDEN = 256  # module's fixed hidden / output dim

# Below this state_dim, layer 1 runs on the VPU (MXU push would be mostly K-padding).
_VPU_LAYER1_MAX_K = 32


def _round_up(x, m):
    return ((x + m - 1) // m) * m


def _choose_batch_tile(B, batch_tile):
    """Batch tile: multiple of 8 (sublane); >=2 grid steps whenever B >= 16 so the
    'parallel' batch axis can be sharded across v7x's 2 TensorCores."""
    B8 = _round_up(B, 8)
    if B8 >= 16:
        TB = min(int(batch_tile), _round_up(pl.cdiv(B8, 2), 8))
    else:
        TB = B8
    return max(8, _round_up(TB, 8))


def _make_kernel(layer1_on_vpu):
    def kernel(x_ref, w1_ref, b1_ref, w2_ref, b2_ref, out_ref):
        x = x_ref[...]  # (TB, S) f32
        if layer1_on_vpu:
            # Layer 1 on the VPU: h[i, n] = sum_k x[i, k] * w1[k, n].
            # K = state_dim is tiny, so this is a short unrolled chain of broadcast
            # mul-adds in exact f32 (co-issues in VALU slots; frees ~1/3 of MXU pushes).
            w1 = w1_ref[...]  # (S, 256) f32
            s_dim = x.shape[1]
            acc = x[:, 0:1] * w1[0:1, :]
            for k in range(1, s_dim):
                acc = acc + x[:, k:k + 1] * w1[k:k + 1, :]
        else:
            # Larger state_dim: bf16 MXU matmul with f32 accumulation.
            acc = jnp.dot(x.astype(w1_ref.dtype), w1_ref[...],
                          preferred_element_type=jnp.float32)
        h = jnp.maximum(acc + b1_ref[...], 0.0)  # (TB, 256) f32

        # Layer 2: bf16 x bf16 on the MXU, f32 accumulation, bias + ReLU on the VPU.
        o = jnp.dot(h.astype(w2_ref.dtype), w2_ref[...],
                    preferred_element_type=jnp.float32)
        o = jnp.maximum(o + b2_ref[...], 0.0)
        out_ref[...] = o.astype(out_ref.dtype)

    return kernel


def critic_embedding(state, w1, b1, w2, b2, *, batch_tile=1024,
                     compute_dtype=jnp.bfloat16, out_dtype=jnp.float32):
    """Fused forward pass of CriticEmbedding.

    state: (B, state_dim) f32
    w1: (state_dim, 256), b1: (1, 256)
    w2: (256, 256),       b2: (1, 256)
    returns: (B, 256) in out_dtype (default f32, matching the PyTorch module).
    """
    B, S = state.shape
    assert w1.shape == (S, HIDDEN) and w2.shape == (HIDDEN, HIDDEN)

    layer1_on_vpu = S <= _VPU_LAYER1_MAX_K
    # Cast the big 256x256 weight (and w1 when it goes to the MXU) to bf16 once in the
    # wrapper: halves weight HBM traffic and uses the fast single-pass MXU mode.
    w2c = w2.astype(compute_dtype)
    w1c = w1 if layer1_on_vpu else w1.astype(compute_dtype)

    TB = _choose_batch_tile(B, batch_tile)
    grid = (pl.cdiv(B, TB),)

    return pl.pallas_call(
        _make_kernel(layer1_on_vpu),
        out_shape=jax.ShapeDtypeStruct((B, HIDDEN), out_dtype),
        grid_spec=pltpu.PrefetchScalarGridSpec(
            num_scalar_prefetch=0,
            grid=grid,
            in_specs=[
                # x: streamed over the batch axis (pipelined under compute).
                pl.BlockSpec((TB, S), lambda i: (i, 0)),
                # Weights / biases: constant block index -> VMEM-resident across steps.
                pl.BlockSpec(w1c.shape, lambda i: (0, 0)),
                pl.BlockSpec(b1.shape, lambda i: (0, 0)),
                pl.BlockSpec(w2c.shape, lambda i: (0, 0)),
                pl.BlockSpec(b2.shape, lambda i: (0, 0)),
            ],
            # Output is lane-dense (256 = 2x128) -> unmasked vector stores.
            out_specs=pl.BlockSpec((TB, HIDDEN), lambda i: (i, 0)),
        ),
        compiler_params=pltpu.CompilerParams(
            # Independent batch tiles: shard across v7x's 2 TensorCores.
            dimension_semantics=("parallel",),
            # Actual footprint is a few MB; this is just a portable upper bound
            # (well under v7x's 64 MiB physical VMEM).
            vmem_limit_bytes=32 * 1024 * 1024,
        ),
    )(state, w1c, b1, w2c, b2)


def init_params(key, state_dim):
    """Deterministic init mimicking PyTorch nn.Linear (U(-1/sqrt(fan_in), +1/sqrt(fan_in)))."""
    k1, k2, k3, k4 = jax.random.split(key, 4)
    bound1 = 1.0 / jnp.sqrt(jnp.float32(state_dim))
    bound2 = 1.0 / jnp.sqrt(jnp.float32(HIDDEN))
    w1 = jax.random.uniform(k1, (state_dim, HIDDEN), jnp.float32, -bound1, bound1)
    b1 = jax.random.uniform(k2, (1, HIDDEN), jnp.float32, -bound1, bound1)
    w2 = jax.random.uniform(k3, (HIDDEN, HIDDEN), jnp.float32, -bound2, bound2)
    b2 = jax.random.uniform(k4, (1, HIDDEN), jnp.float32, -bound2, bound2)
    return w1, b1, w2, b2


def reference(state, w1, b1, w2, b2):
    # Pure f32 math spec (the kernel runs layer 2 in bf16 -> compare with bf16-level
    # tolerance below).
    h = jnp.maximum(state @ w1 + b1, 0.0)
    return jnp.maximum(h @ w2 + b2, 0.0)


if __name__ == "__main__":
    key = jax.random.PRNGKey(0)
    k_in, k_in2, k_in3, k_p, k_p2 = jax.random.split(key, 5)

    # Case 1: tiny RL-sized batch, tiny state_dim (LunarLander-like) -> VPU layer 1,
    # single grid step.
    state_dim = 8
    w1, b1, w2, b2 = init_params(k_p, state_dim)
    state = jax.random.normal(k_in, (8, state_dim), jnp.float32)
    out = jax.block_until_ready(critic_embedding(state, w1, b1, w2, b2))
    ref = reference(state, w1, b1, w2, b2)
    assert out.shape == (8, HIDDEN)
    assert jnp.allclose(out, ref, atol=5e-2, rtol=5e-2)

    # Case 2: mid-size batch -> TB chosen so grid has 2 steps (v7x 2-TC sharding) and
    # the last tile is partial (masked store path).
    state2 = jax.random.normal(k_in2, (24, state_dim), jnp.float32)
    out2 = jax.block_until_ready(critic_embedding(state2, w1, b1, w2, b2))
    ref2 = reference(state2, w1, b1, w2, b2)
    assert out2.shape == (24, HIDDEN)
    assert jnp.allclose(out2, ref2, atol=5e-2, rtol=5e-2)

    # Case 3: larger state_dim -> layer 1 takes the bf16 MXU path.
    state_dim3 = 64
    w1b, b1b, w2b, b2b = init_params(k_p2, state_dim3)
    state3 = jax.random.normal(k_in3, (32, state_dim3), jnp.float32)
    out3 = jax.block_until_ready(critic_embedding(state3, w1b, b1b, w2b, b2b))
    ref3 = reference(state3, w1b, b1b, w2b, b2b)
    assert out3.shape == (32, HIDDEN)
    assert jnp.allclose(out3, ref3, atol=5e-2, rtol=5e-2)

    print("KERNEL_OK")
</pallas_src>

<mosaic_0001>
module attributes {stable_mosaic.version = 11 : i64} {
  func.func @kernel(%arg0: i32, %arg1: memref<8x8xf32, #tpu.memory_space<vmem>>, %arg2: memref<8x256xf32, #tpu.memory_space<vmem>>, %arg3: memref<1x256xf32, #tpu.memory_space<vmem>>, %arg4: memref<256x256xbf16, #tpu.memory_space<vmem>>, %arg5: memref<1x256xf32, #tpu.memory_space<vmem>>, %arg6: memref<8x256xf32, #tpu.memory_space<vmem>>) attributes {dimension_semantics = [#tpu.dimension_semantics<parallel>], iteration_bounds = array<i64: 1>, scalar_prefetch = 0 : i64, scratch_operands = 0 : i64, tpu.core_type = #tpu.core_type<tc>, window_params = [{transform_indices = @transform_0, window_bounds = array<i64: 8, 8>}, {pipeline_mode = #tpu.pipeline_mode<synchronous>, transform_indices = @transform_1, window_bounds = array<i64: 8, 256>}, {pipeline_mode = #tpu.pipeline_mode<synchronous>, transform_indices = @transform_2, window_bounds = array<i64: 1, 256>}, {pipeline_mode = #tpu.pipeline_mode<synchronous>, transform_indices = @transform_3, window_bounds = array<i64: 256, 256>}, {pipeline_mode = #tpu.pipeline_mode<synchronous>, transform_indices = @transform_4, window_bounds = array<i64: 1, 256>}, {transform_indices = @transform_5, window_bounds = array<i64: 8, 256>}]} {
    %c0 = arith.constant 0 : index
    %c0_0 = arith.constant 0 : index
    %0 = vector.load %arg1[%c0, %c0_0] : memref<8x8xf32, #tpu.memory_space<vmem>>, vector<8x8xf32>
    %c0_1 = arith.constant 0 : index
    %c0_2 = arith.constant 0 : index
    %1 = vector.load %arg2[%c0_1, %c0_2] : memref<8x256xf32, #tpu.memory_space<vmem>>, vector<8x256xf32>
    %2 = vector.extract_strided_slice %0 {offsets = [0, 0], sizes = [8, 1], strides = [1, 1]} : vector<8x8xf32> to vector<8x1xf32>
    %3 = vector.extract_strided_slice %1 {offsets = [0, 0], sizes = [1, 256], strides = [1, 1]} : vector<8x256xf32> to vector<1x256xf32>
    %4 = vector.broadcast %2 : vector<8x1xf32> to vector<8x256xf32>
    %5 = vector.broadcast %3 : vector<1x256xf32> to vector<8x256xf32>
    %6 = arith.mulf %4, %5 : vector<8x256xf32>
    %7 = vector.extract_strided_slice %0 {offsets = [0, 1], sizes = [8, 1], strides = [1, 1]} : vector<8x8xf32> to vector<8x1xf32>
    %8 = vector.extract_strided_slice %1 {offsets = [1, 0], sizes = [1, 256], strides = [1, 1]} : vector<8x256xf32> to vector<1x256xf32>
    %9 = vector.broadcast %7 : vector<8x1xf32> to vector<8x256xf32>
    %10 = vector.broadcast %8 : vector<1x256xf32> to vector<8x256xf32>
    %11 = arith.mulf %9, %10 : vector<8x256xf32>
    %12 = arith.addf %6, %11 : vector<8x256xf32>
    %13 = vector.extract_strided_slice %0 {offsets = [0, 2], sizes = [8, 1], strides = [1, 1]} : vector<8x8xf32> to vector<8x1xf32>
    %14 = vector.extract_strided_slice %1 {offsets = [2, 0], sizes = [1, 256], strides = [1, 1]} : vector<8x256xf32> to vector<1x256xf32>
    %15 = vector.broadcast %13 : vector<8x1xf32> to vector<8x256xf32>
    %16 = vector.broadcast %14 : vector<1x256xf32> to vector<8x256xf32>
    %17 = arith.mulf %15, %16 : vector<8x256xf32>
    %18 = arith.addf %12, %17 : vector<8x256xf32>
    %19 = vector.extract_strided_slice %0 {offsets = [0, 3], sizes = [8, 1], strides = [1, 1]} : vector<8x8xf32> to vector<8x1xf32>
    %20 = vector.extract_strided_slice %1 {offsets = [3, 0], sizes = [1, 256], strides = [1, 1]} : vector<8x256xf32> to vector<1x256xf32>
    %21 = vector.broadcast %19 : vector<8x1xf32> to vector<8x256xf32>
    %22 = vector.broadcast %20 : vector<1x256xf32> to vector<8x256xf32>
    %23 = arith.mulf %21, %22 : vector<8x256xf32>
    %24 = arith.addf %18, %23 : vector<8x256xf32>
    %25 = vector.extract_strided_slice %0 {offsets = [0, 4], sizes = [8, 1], strides = [1, 1]} : vector<8x8xf32> to vector<8x1xf32>
    %26 = vector.extract_strided_slice %1 {offsets = [4, 0], sizes = [1, 256], strides = [1, 1]} : vector<8x256xf32> to vector<1x256xf32>
    %27 = vector.broadcast %25 : vector<8x1xf32> to vector<8x256xf32>
    %28 = vector.broadcast %26 : vector<1x256xf32> to vector<8x256xf32>
    %29 = arith.mulf %27, %28 : vector<8x256xf32>
    %30 = arith.addf %24, %29 : vector<8x256xf32>
    %31 = vector.extract_strided_slice %0 {offsets = [0, 5], sizes = [8, 1], strides = [1, 1]} : vector<8x8xf32> to vector<8x1xf32>
    %32 = vector.extract_strided_slice %1 {offsets = [5, 0], sizes = [1, 256], strides = [1, 1]} : vector<8x256xf32> to vector<1x256xf32>
    %33 = vector.broadcast %31 : vector<8x1xf32> to vector<8x256xf32>
    %34 = vector.broadcast %32 : vector<1x256xf32> to vector<8x256xf32>
    %35 = arith.mulf %33, %34 : vector<8x256xf32>
    %36 = arith.addf %30, %35 : vector<8x256xf32>
    %37 = vector.extract_strided_slice %0 {offsets = [0, 6], sizes = [8, 1], strides = [1, 1]} : vector<8x8xf32> to vector<8x1xf32>
    %38 = vector.extract_strided_slice %1 {offsets = [6, 0], sizes = [1, 256], strides = [1, 1]} : vector<8x256xf32> to vector<1x256xf32>
    %39 = vector.broadcast %37 : vector<8x1xf32> to vector<8x256xf32>
    %40 = vector.broadcast %38 : vector<1x256xf32> to vector<8x256xf32>
    %41 = arith.mulf %39, %40 : vector<8x256xf32>
    %42 = arith.addf %36, %41 : vector<8x256xf32>
    %43 = vector.extract_strided_slice %0 {offsets = [0, 7], sizes = [8, 1], strides = [1, 1]} : vector<8x8xf32> to vector<8x1xf32>
    %44 = vector.extract_strided_slice %1 {offsets = [7, 0], sizes = [1, 256], strides = [1, 1]} : vector<8x256xf32> to vector<1x256xf32>
    %45 = vector.broadcast %43 : vector<8x1xf32> to vector<8x256xf32>
    %46 = vector.broadcast %44 : vector<1x256xf32> to vector<8x256xf32>
    %47 = arith.mulf %45, %46 : vector<8x256xf32>
    %48 = arith.addf %42, %47 : vector<8x256xf32>
    %c0_3 = arith.constant 0 : index
    %c0_4 = arith.constant 0 : index
    %49 = vector.load %arg3[%c0_3, %c0_4] : memref<1x256xf32, #tpu.memory_space<vmem>>, vector<1x256xf32>
    %50 = vector.broadcast %49 : vector<1x256xf32> to vector<8x256xf32>
    %51 = arith.addf %48, %50 : vector<8x256xf32>
    %cst = arith.constant 0.000000e+00 : f32
    %52 = vector.broadcast %cst : f32 to vector<8x256xf32>
    %53 = arith.maximumf %51, %52 : vector<8x256xf32>
    %54 = arith.truncf %53 : vector<8x256xf32> to vector<8x256xbf16>
    %c0_5 = arith.constant 0 : index
    %c0_6 = arith.constant 0 : index
    %55 = vector.load %arg4[%c0_5, %c0_6] : memref<256x256xbf16, #tpu.memory_space<vmem>>, vector<256x256xbf16>
    %cst_7 = arith.constant dense<0.000000e+00> : vector<8x256xf32>
    %56 = tpu.matmul %54, %55, %cst_7 {dimension_numbers = #tpu.dot_dimension_numbers<[1], [0], [0], [1], [0, 0, 1, 1], [], []>} : vector<8x256xbf16>, vector<256x256xbf16>, vector<8x256xf32> -> vector<8x256xf32>
    %c0_8 = arith.constant 0 : index
    %c0_9 = arith.constant 0 : index
    %57 = vector.load %arg5[%c0_8, %c0_9] : memref<1x256xf32, #tpu.memory_space<vmem>>, vector<1x256xf32>
    %58 = vector.broadcast %57 : vector<1x256xf32> to vector<8x256xf32>
    %59 = arith.addf %56, %58 : vector<8x256xf32>
    %cst_10 = arith.constant 0.000000e+00 : f32
    %60 = vector.broadcast %cst_10 : f32 to vector<8x256xf32>
    %61 = arith.maximumf %59, %60 : vector<8x256xf32>
    %c0_11 = arith.constant 0 : index
    %c0_12 = arith.constant 0 : index
    %62 = vector.load %arg6[%c0_11, %c0_12] : memref<8x256xf32, #tpu.memory_space<vmem>>, vector<8x256xf32>
    tpu.vector_store %arg6[%c0_11, %c0_12], %61 {strides = array<i32>} : memref<8x256xf32, #tpu.memory_space<vmem>>, vector<8x256xf32>,
    return
  }
  func.func @transform_0(%arg0: i32) -> (i32, i32) {
    %c0_i32 = arith.constant 0 : i32
    %c0_i32_0 = arith.constant 0 : i32
    return %arg0, %c0_i32 : i32, i32
  }
  func.func @transform_1(%arg0: i32) -> (i32, i32) {
    %c0_i32 = arith.constant 0 : i32
    %c0_i32_0 = arith.constant 0 : i32
    %c0_i32_1 = arith.constant 0 : i32
    return %c0_i32, %c0_i32_0 : i32, i32
  }
  func.func @transform_2(%arg0: i32) -> (i32, i32) {
    %c0_i32 = arith.constant 0 : i32
    %c0_i32_0 = arith.constant 0 : i32
    %c0_i32_1 = arith.constant 0 : i32
    return %c0_i32, %c0_i32_0 : i32, i32
  }
  func.func @transform_3(%arg0: i32) -> (i32, i32) {
    %c0_i32 = arith.constant 0 : i32
    %c0_i32_0 = arith.constant 0 : i32
    %c0_i32_1 = arith.constant 0 : i32
    return %c0_i32, %c0_i32_0 : i32, i32
  }
  func.func @transform_4(%arg0: i32) -> (i32, i32) {
    %c0_i32 = arith.constant 0 : i32
    %c0_i32_0 = arith.constant 0 : i32
    %c0_i32_1 = arith.constant 0 : i32
    return %c0_i32, %c0_i32_0 : i32, i32
  }
  func.func @transform_5(%arg0: i32) -> (i32, i32) {
    %c0_i32 = arith.constant 0 : i32
    %c0_i32_0 = arith.constant 0 : i32
    return %arg0, %c0_i32 : i32, i32
  }
}

</mosaic_0001>

<bundles_post_ra>
// kernel: tpu_custom_call.1
= control target key start
LH: loop header
LB: loop body
LE: loop exit
PB: predicated region body
PF: predicated region fallthrough
CT: control target
= control target key end

     0   :  { %10 = vsyncpa [#allocation3], 0  ;;  %s778_s0 = inlined_call_operand.hbm [shape: f32[8,8], index: 0, kind: input, shape index: {}]   ;;  %s779_s1 = inlined_call_operand.hbm [shape: f32[8,256], index: 1, kind: input, shape index: {}]   ;;  %s780_s2 = inlined_call_operand.vmem [shape: f32[1,256], index: 2, kind: input, shape index: {}]   ;;  %s781_s3 = inlined_call_operand.hbm [shape: bf16[256,256], index: 3, kind: input, shape index: {}]   ;;  %s782_s4 = inlined_call_operand.vmem [shape: f32[1,256], index: 4, kind: input, shape index: {}]   ;;  %s783_s5 = inlined_call_operand.hbm [shape: f32[8,256], index: 5, kind: output, shape index: {}]  }
   0x1   :  { %11 = vsyncpa [#allocation6], 0 }
   0x2   :  { %12 = vsyncpa [#allocation4], 0  ;;  %s668_s18 = smov [#allocation5]   ;;  %s669_s20 = smov [#allocation2]  }
   0x3   :  { %s29_s19 = sshll.u32 %s668_s18, 4  ;;  %s19_s21 = sshll.u32 %s669_s20, 4  ;;  %s30_s19 = int_to_ptr.vmem [resolvable:$true] %s29_s19  ;;  %s20_s21 = int_to_ptr.vmem [resolvable:$true] %s19_s21 }
   0x4   :  { %s574_s24 = scalar_lea.hbm %s779_s1, 256 }
   0x5   :  { %p575_p0 = scmp.ne.s32.totalorder %s779_s1, %s574_s24  ;;  %p578_p1 = scmp.lt.u32.totalorder %s574_s24, %s779_s1 }
   0x7   :  { %p580_p2 = pnand %p578_p1, %p575_p0 }
   0x9   :  { %583 = shalt.err (!%p580_p2)
}
   0xa   :  { %s584_s29 = scalar_lea.vmem %s30_s19, 256  ;;  %p589_p4 = scmp.lt.s32.totalorder %s30_s19, %s30_s19 }
   0xb   :  { %p585_p3 = scmp.ne.s32.totalorder %s30_s19, %s584_s29  ;;  %p590_p5 = scmp.lt.s32.totalorder %s584_s29, %s584_s29 }
   0xd   :  { %p591_p6 = por %p590_p5, %p589_p4 }
   0xf   :  { %p592_p7 = pnand %p591_p6, %p585_p3 }
  0x11   :  { %595 = shalt.err (!%p592_p7)
}
  0x12   :  { %32 = dma.hbm_to_vmem [thread:$0]  %s779_s1, 256, %s30_s19, [#allocation6]  }
  0x13   :  { %s596_s9 = scalar_lea.hbm %s778_s0, 128 }
  0x14   :  { %p597_p8 = scmp.ne.s32.totalorder %s778_s0, %s596_s9  ;;  %p600_p9 = scmp.lt.u32.totalorder %s596_s9, %s778_s0 }
  0x16   :  { %p602_p10 = pnand %p600_p9, %p597_p8 }
  0x18   :  { %605 = shalt.err (!%p602_p10)
}
  0x19   :  { %s606_s14 = scalar_lea.vmem %s20_s21, 128  ;;  %p611_p12 = scmp.lt.s32.totalorder %s20_s21, %s20_s21 }
  0x1a   :  { %p607_p11 = scmp.ne.s32.totalorder %s20_s21, %s606_s14  ;;  %p612_p13 = scmp.lt.s32.totalorder %s606_s14, %s606_s14 }
  0x1c   :  { %p613_p0 = por %p612_p13, %p611_p12 }
  0x1e   :  { %p614_p1 = pnand %p613_p0, %p607_p11 }
  0x20   :  { %617 = shalt.err (!%p614_p1)
}
  0x21   :  { %22 = dma.hbm_to_vmem [thread:$0]  %s778_s0, 128, %s20_s21, [#allocation3]  }
  0x22   :  { %s670_s16 = smov [#allocation7]   ;;  %s618_s20 = scalar_lea.hbm %s781_s3, 4096 }
  0x23   :  { %s40_s17 = sshll.u32 %s670_s16, 4  ;;  %p619_p2 = scmp.ne.s32.totalorder %s781_s3, %s618_s20  ;;  %s41_s17 = int_to_ptr.vmem [resolvable:$true] %s40_s17 }
  0x24   :  { %p622_p3 = scmp.lt.u32.totalorder %s618_s20, %s781_s3 }
  0x26   :  { %p624_p4 = pnand %p622_p3, %p619_p2 }
  0x28   :  { %627 = shalt.err (!%p624_p4)
}
  0x29   :  { %s628_s26 = scalar_lea.vmem %s41_s17, 4096  ;;  %p633_p6 = scmp.lt.s32.totalorder %s41_s17, %s41_s17 }
  0x2a   :  { %p629_p5 = scmp.ne.s32.totalorder %s41_s17, %s628_s26  ;;  %p634_p7 = scmp.lt.s32.totalorder %s628_s26, %s628_s26 }
  0x2c   :  { %p635_p8 = por %p634_p7, %p633_p6 }
  0x2e   :  { %p636_p9 = pnand %p635_p8, %p629_p5 }
  0x30   :  { %639 = shalt.err (!%p636_p9)
}
  0x31   :  { %s671_s0 = smov 128   ;;  %s672_s21 = smov 8  }
  0x32   :  { %46 = dma.hbm_to_vmem [thread:$0]  %s781_s3, 4096, %s41_s17, [#allocation6], %s671_s0, %s671_s0, %s672_s21  }
  0x33   :  { %662 = dma.done.wait [#allocation3], 128  }
  0x34   :  { %663 = vsyncadd [#allocation3], 4294967168 }
  0x35   :  { %664 = dma.done.wait [#allocation6], 4352  }
  0x36   :  { %665 = vsyncadd [#allocation6], 4294962944  ;;  %v673_v0 = vmov 2   ;;  %v674_v1 = vmov 0   ;;  %v58_v2 = vld [vmem:[#allocation2] sm:$0xff]  ;;  %v675_v7 = vmov 3   ;;  %v66_v41 = vlaneseq }
  0x37   :  { %519 = vset.pattern.permute.xlu1 %v673_v0  ;;  %517 = vset.pattern.permute.xlu0 %v674_v1  ;;  %v526_v3 = vld [vmem:[#allocation7 + $0x4] ss:$8 sps:$4 sm:$0xff]   ;;  %v528_v4 = vld [vmem:[#allocation7] ss:$8 sps:$4 sm:$0xff]   ;;  %v529_v5 = vld [vmem:[#allocation7 + $0x14] ss:$8 sps:$4 sm:$0xff]  }
  0x38   :  { %93 = vperm.xlu1 %519, %v58_v2   ;;  %63 = vperm.xlu0 %517, %v58_v2   ;;  %v531_v6 = vld [vmem:[#allocation7 + $0x10] ss:$8 sps:$4 sm:$0xff]   ;;  %v676_v8 = vmov 1   ;;  %v532_v9 = vld [vmem:[#allocation7 + $0x24] ss:$8 sps:$4 sm:$0xff]   ;;  %v677_v12 = vmov 4  }
  0x39   :  { %410 = vmatprep.subr.bf16.mxu0 %v526_v3  ;;  %v534_v10 = vld [vmem:[#allocation7 + $0x20] ss:$8 sps:$4 sm:$0xff]   ;;  %v535_v11 = vld [vmem:[#allocation7 + $0x34] ss:$8 sps:$4 sm:$0xff]   ;;  %v678_v13 = vmov 5   ;;  %v679_v16 = vmov 6  }
  0x3a   :  { %411 = vmatpush1.bf16.msra.mxu0 %v528_v4  ;;  %v537_v14 = vld [vmem:[#allocation7 + $0x30] ss:$8 sps:$4 sm:$0xff]   ;;  %v538_v15 = vld [vmem:[#allocation7 + $0x44] ss:$8 sps:$4 sm:$0xff]   ;;  %v540_v17 = vld [vmem:[#allocation7 + $0x40] ss:$8 sps:$4 sm:$0xff]  }
  0x3b   :  { %412 = vmatprep.subr.bf16.mxu0 %v529_v5  ;;  %v541_v18 = vld [vmem:[#allocation7 + $0x54] ss:$8 sps:$4 sm:$0xff]   ;;  %v680_v19 = vmov 7   ;;  %v543_v20 = vld [vmem:[#allocation7 + $0x50] ss:$8 sps:$4 sm:$0xff]   ;;  %v67_v42 = vshrl.u32 %v66_v41, 7 }
  0x3c   :  { %520 = vset.pattern.permute.xlu1 %v675_v7  ;;  %518 = vset.pattern.permute.xlu0 %v676_v8  ;;  %v544_v21 = vld [vmem:[#allocation7 + $0x64] ss:$8 sps:$4 sm:$0xff]   ;;  %v546_v22 = vld [vmem:[#allocation7 + $0x60] ss:$8 sps:$4 sm:$0xff]   ;;  %v547_v23 = vld [vmem:[#allocation7 + $0x74] ss:$8 sps:$4 sm:$0xff]  }
  0x3d   :  { %109 = vperm.xlu1 %520, %v58_v2   ;;  %77 = vperm.xlu0 %518, %v58_v2   ;;  %v549_v24 = vld [vmem:[#allocation7 + $0x70] ss:$8 sps:$4 sm:$0xff]   ;;  %v550_v25 = vld [vmem:[#allocation7 + $0x84] ss:$8 sps:$4 sm:$0xff]   ;;  %v552_v26 = vld [vmem:[#allocation7 + $0x80] ss:$8 sps:$4 sm:$0xff]  }
  0x3e   :  { %413 = vmatpush1.bf16.msra.mxu0 %v531_v6  ;;  %v553_v27 = vld [vmem:[#allocation7 + $0x94] ss:$8 sps:$4 sm:$0xff]   ;;  %v555_v28 = vld [vmem:[#allocation7 + $0x90] ss:$8 sps:$4 sm:$0xff]   ;;  %v556_v29 = vld [vmem:[#allocation7 + $0xa4] ss:$8 sps:$4 sm:$0xff]  }
  0x3f   :  { %414 = vmatprep.subr.bf16.mxu0 %v532_v9  ;;  %v558_v30 = vld [vmem:[#allocation7 + $0xa0] ss:$8 sps:$4 sm:$0xff]   ;;  %v559_v31 = vld [vmem:[#allocation7 + $0xb4] ss:$8 sps:$4 sm:$0xff]   ;;  %v561_v32 = vld [vmem:[#allocation7 + $0xb0] ss:$8 sps:$4 sm:$0xff]  }
  0x40   :  { %v562_v33 = vld [vmem:[#allocation7 + $0xc4] ss:$8 sps:$4 sm:$0xff]   ;;  %v564_v34 = vld [vmem:[#allocation7 + $0xc0] ss:$8 sps:$4 sm:$0xff]   ;;  %v565_v35 = vld [vmem:[#allocation7 + $0xd4] ss:$8 sps:$4 sm:$0xff]  }
  0x41   :  { %521 = vset.pattern.permute.xlu1 %v677_v12  ;;  %522 = vset.pattern.permute.xlu0 %v678_v13  ;;  %v567_v36 = vld [vmem:[#allocation7 + $0xd0] ss:$8 sps:$4 sm:$0xff]   ;;  %v568_v37 = vld [vmem:[#allocation7 + $0xe4] ss:$8 sps:$4 sm:$0xff]   ;;  %v570_v38 = vld [vmem:[#allocation7 + $0xe0] ss:$8 sps:$4 sm:$0xff]  }
  0x42   :  { %125 = vperm.xlu1 %521, %v58_v2   ;;  %141 = vperm.xlu0 %522, %v58_v2   ;;  %v571_v39 = vld [vmem:[#allocation7 + $0xf4] ss:$8 sps:$4 sm:$0xff]   ;;  %v573_v40 = vld [vmem:[#allocation7 + $0xf0] ss:$8 sps:$4 sm:$0xff]   ;;  %v748_v43 = vsub.s32 0, %v67_v42  ;;  %v750_v44 = vsub.s32 1, %v67_v42 }
  0x43   :  { %415 = vmatpush1.bf16.msra.mxu0 %v534_v10  ;;  %v98_v45 = vsub.s32 2, %v67_v42  ;;  %v59_v48 = vld [vmem:[#allocation5] sm:$0xff]  ;;  %v60_v49 = vld [vmem:[#allocation5 + $0x8] sm:$0xff]  ;;  %v114_v50 = vsub.s32 3, %v67_v42  ;;  %v130_v55 = vsub.s32 4, %v67_v42  ;;  %v146_v62 = vsub.s32 5, %v67_v42 }
  0x44   :  { %416 = vmatprep.subr.bf16.mxu0 %v535_v11  ;;  %v69_v51 = vrot.slane %v59_v48, %v748_v43  ;;  %v73_v52 = vrot.slane %v60_v49, %v748_v43  ;;  %v83_v53 = vrot.slane %v59_v48, %v750_v44  ;;  %v87_v54 = vrot.slane %v60_v49, %v750_v44  ;;  %s681_s6 = smov [#allocation8]  }
  0x45   :  { %v99_v56 = vrot.slane %v59_v48, %v98_v45  ;;  %v103_v57 = vrot.slane %v60_v49, %v98_v45  ;;  %v115_v58 = vrot.slane %v59_v48, %v114_v50  ;;  %v119_v59 = vrot.slane %v60_v49, %v114_v50  ;;  %s461_s7 = sshll.u32 %s681_s6, 4  ;;  %s462_s7 = int_to_ptr.vmem [resolvable:$true] %s461_s7 }
  0x46   :  { %523 = vset.pattern.permute.xlu1 %v679_v16  ;;  %525 = vset.pattern.permute.xlu0 %v680_v19  ;;  %v131_v3 = vrot.slane %v59_v48, %v130_v55  ;;  %v135_v4 = vrot.slane %v60_v49, %v130_v55  ;;  %v147_v9 = vrot.slane %v59_v48, %v146_v62  ;;  %v162_v11 = vsub.s32 6, %v67_v42  ;;  %s640_s8 = scalar_lea.vmem %s462_s7, 256  ;;  %p645_p11 = scmp.lt.s32.totalorder %s462_s7, %s462_s7 }
  0x47   :  { %157 = vperm.xlu1 %523, %v58_v2   ;;  %417 = vmatpush1.bf16.msra.mxu0 %v537_v14  ;;  %v151_v10 = vrot.slane %v60_v49, %v146_v62  ;;  %p641_p10 = scmp.ne.s32.totalorder %s462_s7, %s640_s8  ;;  %p646_p12 = scmp.lt.s32.totalorder %s640_s8, %s640_s8 }
  0x48   :  { %418 = vmatprep.subr.bf16.mxu0 %v538_v15 }
  0x49   :  { %p647_p13 = por %p646_p12, %p645_p11 }
  0x4b   :  { %524 = vset.pattern.permute.xlu1 %v680_v19  ;;  %419 = vmatpush1.bf16.msra.mxu0 %v540_v17  ;;  %p648_p0 = pnand %p647_p13, %p641_p10 }
  0x4c   :  { %173 = vperm.xlu1 %524, %v58_v2   ;;  %420 = vmatprep.subr.bf16.mxu0 %v541_v18 }
  0x4f   :  { %421 = vmatpush1.bf16.msra.mxu0 %v543_v20 }
  0x50   :  { %422 = vmatprep.subr.bf16.mxu0 %v544_v21 }
  0x53   :  { %423 = vmatpush1.bf16.msra.mxu0 %v546_v22  ;;  %v178_v22 = vsub.s32 7, %v67_v42 }
  0x54   :  { %424 = vmatprep.subr.bf16.mxu0 %v547_v23 }
  0x57   :  { %425 = vmatpush1.bf16.msra.mxu0 %v549_v24 }
  0x58   :  { %426 = vmatprep.subr.bf16.mxu0 %v550_v25  ;;  %v163_v25 = vrot.slane %v59_v48, %v162_v11 }
  0x5b   :  { %427 = vmatpush1.bf16.msra.mxu0 %v552_v26  ;;  %v167_v26 = vrot.slane %v60_v49, %v162_v11 }
  0x5c   :  { %428 = vmatprep.subr.bf16.mxu0 %v553_v27 }
  0x5f   :  { %429 = vmatpush1.bf16.msra.mxu0 %v555_v28 }
  0x60   :  { %430 = vmatprep.subr.bf16.mxu0 %v556_v29 }
  0x63   :  { %431 = vmatpush1.bf16.msra.mxu0 %v558_v30  ;;  %v179_v30 = vrot.slane %v59_v48, %v178_v22 }
  0x64   :  { %432 = vmatprep.subr.bf16.mxu0 %v559_v31  ;;  %v183_v31 = vrot.slane %v60_v49, %v178_v22 }
  0x67   :  { %433 = vmatpush1.bf16.msra.mxu0 %v561_v32 }
  0x68   :  { %434 = vmatprep.subr.bf16.mxu0 %v562_v33 }
  0x6b   :  { %435 = vmatpush1.bf16.msra.mxu0 %v564_v34 }
  0x6c   :  { %436 = vmatprep.subr.bf16.mxu0 %v565_v35 }
  0x6f   :  { %437 = vmatpush1.bf16.msra.mxu0 %v567_v36  ;;  %v188_v36 = vld [vmem:[%s780_s2] sm:$0x3] }
  0x70   :  { %438 = vmatprep.subr.bf16.mxu0 %v568_v37 }
  0x73   :  { %439 = vmatpush1.bf16.msra.mxu0 %v570_v38  ;;  %v193_v38 = vrot.slane %v188_v36, %v748_v43 }
  0x74   :  { %440 = vmatprep.subr.bf16.mxu0 %v571_v39  ;;  %v197_v39 = vrot.slane %v188_v36, %v750_v44 }
  0x77   :  { %441 = vmatpush1.bf16.msra.mxu0 %v573_v40 }
  0xb7   :  { %v94_v46 = vpop.permute.xlu1 %93  ;;  %v64_v47 = vpop.permute.xlu0 %63 }
  0xb8   :  { %v74_v63 = vmul.f32 %v69_v51, %v64_v47  ;;  %v75_v0 = vmul.f32 %v73_v52, %v64_v47  ;;  %v104_v5 = vmul.f32 %v99_v56, %v94_v46  ;;  %v105_v6 = vmul.f32 %v103_v57, %v94_v46 }
  0xbc   :  { %v110_v60 = vpop.permute.xlu1 %109  ;;  %v78_v61 = vpop.permute.xlu0 %77 }
  0xbd   :  { %v88_v1 = vmul.f32 %v83_v53, %v78_v61  ;;  %v89_v2 = vmul.f32 %v87_v54, %v78_v61  ;;  %v120_v12 = vmul.f32 %v115_v58, %v110_v60  ;;  %v121_v13 = vmul.f32 %v119_v59, %v110_v60  ;;  %v238_v54 = vld [vmem:[%s782_s4] sm:$0x3] }
  0xbe   :  { %v243_v55 = vrot.slane %v238_v54, %v748_v43  ;;  %v247_v56 = vrot.slane %v238_v54, %v750_v44 }
  0xbf   :  { %v90_v7 = vadd.f32 %v88_v1, %v74_v63  ;;  %v91_v8 = vadd.f32 %v89_v2, %v75_v0 }
  0xc1   :  { %v106_v14 = vadd.f32 %v104_v5, %v90_v7  ;;  %v107_v15 = vadd.f32 %v105_v6, %v91_v8  ;;  %v126_v16 = vpop.permute.xlu1 %125  ;;  %v142_v17 = vpop.permute.xlu0 %141 }
  0xc2   :  { %v136_v18 = vmul.f32 %v131_v3, %v126_v16  ;;  %v137_v19 = vmul.f32 %v135_v4, %v126_v16  ;;  %v152_v23 = vmul.f32 %v147_v9, %v142_v17  ;;  %v153_v24 = vmul.f32 %v151_v10, %v142_v17 }
  0xc3   :  { %v122_v20 = vadd.f32 %v120_v12, %v106_v14  ;;  %v123_v21 = vadd.f32 %v121_v13, %v107_v15 }
  0xc5   :  { %v138_v27 = vadd.f32 %v136_v18, %v122_v20  ;;  %v139_v28 = vadd.f32 %v137_v19, %v123_v21 }
  0xc6   :  { %v158_v29 = vpop.permute.xlu1 %157 }
  0xc7   :  { %v154_v32 = vadd.f32 %v152_v23, %v138_v27  ;;  %v155_v33 = vadd.f32 %v153_v24, %v139_v28  ;;  %v168_v34 = vmul.f32 %v163_v25, %v158_v29  ;;  %v169_v35 = vmul.f32 %v167_v26, %v158_v29 }
  0xc9   :  { %v170_v40 = vadd.f32 %v168_v34, %v154_v32  ;;  %v171_v41 = vadd.f32 %v169_v35, %v155_v33 }
  0xcb   :  { %v174_v37 = vpop.permute.xlu1 %173 }
  0xcc   :  { %v184_v42 = vmul.f32 %v179_v30, %v174_v37  ;;  %v185_v45 = vmul.f32 %v183_v31, %v174_v37 }
  0xce   :  { %v186_v46 = vadd.f32 %v184_v42, %v170_v40  ;;  %v187_v47 = vadd.f32 %v185_v45, %v171_v41 }
  0xd0   :  { %v201_v48 = vadd.f32 %v197_v39, %v187_v47  ;;  %v200_v49 = vadd.f32 %v193_v38, %v186_v46 }
  0xd2   :  { %v203_v50 = vmax.f32 %v201_v48, 0.0  ;;  %v202_v51 = vmax.f32 %v200_v49, 0.0 }
  0xd4   :  { %v205_v52 = vpack.c.bf16 %v203_v50, %v203_v50  ;;  %v204_v53 = vpack.c.bf16 %v202_v51, %v202_v51 }
  0xd6   :  { %442 = vmatprep.mubr.bf16.mxu0 %v205_v52 }
  0xd7   :  { %443 = vmatmul.mubr.bf16.vlgmr.msra.gmra.mrb[0].mxu0 %v204_v53 }
 0x1aa   :  { %v444_v57 = vpop.f32.mrb[0].mxu0 }
 0x1ab   :  { %v445_v58 = vadd.f32 %v444_v57, %v243_v55  ;;  %v446_v59 = vpop.f32.mrb[1].mxu0 }
 0x1ac   :  { %v447_v60 = vadd.f32 %v446_v59, %v247_v56  ;;  %v448_v61 = vpop.f32.mrb[2].mxu0 }
 0x1ad   :  { %v451_v62 = vmax.f32 %v445_v58, 0.0  ;;  %v449_v63 = vpop.f32.mrb[3].mxu0 }
 0x1ae   :  { %v452_v0 = vmax.f32 %v447_v60, 0.0 }
 0x1af   :  { %453 = vst [vmem:[#allocation8] sm:$0xff] %v451_v62 }
 0x1b0   :  { %454 = vst [vmem:[#allocation8 + $0x8] sm:$0xff] %v452_v0 }
 0x1b1   :  { %651 = shalt.err (!%p648_p0)
}
 0x1b2   :  { %s652_s10 = scalar_lea.hbm %s783_s5, 256 }
 0x1b3   :  { %p653_p1 = scmp.ne.s32.totalorder %s783_s5, %s652_s10  ;;  %p656_p2 = scmp.lt.u32.totalorder %s652_s10, %s783_s5 }
 0x1b5   :  { %p658_p3 = pnand %p656_p2, %p653_p1 }
 0x1b7   :  { %661 = shalt.err (!%p658_p3)
}
 0x1b8   :  { %464 = dma.vmem_to_hbm [thread:$0]  %s462_s7, 256, %s783_s5, [#allocation4]  }
 0x1b9   :  { %666 = dma.done.wait [#allocation4], 256  }
 0x1ba   :  { %667 = vsyncadd [#allocation4], 4294967040 }
 0x1bb   :  { %468 = vsyncpa [#allocation3], 1 }
 0x1bc   :  { %469 = vsyncpa [#allocation6], 1 }
 0x1bd   :  { %470 = vsyncpa [#allocation4], 1 }

</bundles_post_ra>
